<compile_context>
chip_gen: v7x
topology: tpu7x:2x2x1
jax: 0.10.0
libtpu: 0.0.40
codegen_flags: <defaults>
</compile_context>

<pallas_src>
import functools

import jax
import jax.numpy as jnp
from jax.experimental import pallas as pl
from jax.experimental.pallas import tpu as pltpu


def _round_up(a: int, m: int) -> int:
    return (a + m - 1) // m * m


def _pad2(w, rows, cols):
    out = jnp.zeros((rows, cols), w.dtype)
    return out.at[: w.shape[0], : w.shape[1]].set(w)


# ---------------------------------------------------------------------------
# Kernel
# ---------------------------------------------------------------------------
def autoencoder_kernel(x_ref,
                       we1_ref, be1_ref, we2_ref, be2_ref,   # encoder (padded)
                       wh1_ref, bh1_ref,                     # fused dec1|dom1 head
                       wh2_ref, bh2_ref,                     # fused dec2|dom2 head
                       out_ref):
    cdt = we1_ref.dtype      # bf16 MXU operand dtype
    x = x_ref[...]           # already bf16 (cast once on the host)

    # ---- encoder: Linear -> ReLU -> Linear ----
    # f32 accumulation + f32 bias/ReLU (safe on v5e's f32-only VALU).
    h = jnp.dot(x, we1_ref[...], preferred_element_type=jnp.float32) + be1_ref[...]
    h = jnp.maximum(h, 0.0)
    enc = jnp.dot(h.astype(cdt), we2_ref[...],
                  preferred_element_type=jnp.float32) + be2_ref[...]

    # F.relu(encoded); grad_reverse is identity in the forward pass.
    r = jnp.maximum(enc, 0.0)

    # ---- fused first head: [decoder Linear(250,64) | domain Linear(250,50)] ----
    g = jnp.dot(r.astype(cdt), wh1_ref[...],
                preferred_element_type=jnp.float32) + bh1_ref[...]
    g = jnp.maximum(g, 0.0)   # both branches apply ReLU here; padded cols stay 0

    # ---- fused second head: [decoder Linear(64,32) | domain Linear(50,1)] ----
    out = jnp.dot(g.astype(cdt), wh2_ref[...],
                  preferred_element_type=jnp.float32) + bh2_ref[...]
    out_ref[...] = out.astype(out_ref.dtype)   # bf16 writeback (halves HBM traffic)


# ---------------------------------------------------------------------------
# Host-side parameter packing (done once, not per call)
# ---------------------------------------------------------------------------
def pack_params(params, shape, compute_dtype=jnp.bfloat16):
    d_in, h1, enc = shape                      # 32, 64, 250
    dom_h = params["wm1"].shape[1]             # 50
    d_out = params["wd2"].shape[1]             # 32
    dom_o = params["wm2"].shape[1]             # 1

    H1P = _round_up(h1, 128)                   # 128
    ENCP = _round_up(enc, 128)                 # 256
    HEADP = _round_up(h1 + dom_h, 128)         # 128 (64 decoder + 50 domain)
    OUTP = _round_up(d_out + dom_o, 128)       # 128 (32 recon + 1 domain)

    we1 = _pad2(params["we1"], d_in, H1P)
    be1 = _pad2(params["be1"], 1, H1P)
    we2 = _pad2(params["we2"], H1P, ENCP)
    be2 = _pad2(params["be2"], 1, ENCP)

    wh1 = jnp.zeros((ENCP, HEADP), jnp.float32)
    wh1 = wh1.at[:enc, :h1].set(params["wd1"])
    wh1 = wh1.at[:enc, h1:h1 + dom_h].set(params["wm1"])
    bh1 = jnp.zeros((1, HEADP), jnp.float32)
    bh1 = bh1.at[:, :h1].set(params["bd1"])
    bh1 = bh1.at[:, h1:h1 + dom_h].set(params["bm1"])

    wh2 = jnp.zeros((HEADP, OUTP), jnp.float32)
    wh2 = wh2.at[:h1, :d_out].set(params["wd2"])
    wh2 = wh2.at[h1:h1 + dom_h, d_out:d_out + dom_o].set(params["wm2"])
    bh2 = jnp.zeros((1, OUTP), jnp.float32)
    bh2 = bh2.at[:, :d_out].set(params["bd2"])
    bh2 = bh2.at[:, d_out:d_out + dom_o].set(params["bm2"])

    packed = {
        "we1": we1.astype(compute_dtype), "be1": be1,   # biases stay f32
        "we2": we2.astype(compute_dtype), "be2": be2,
        "wh1": wh1.astype(compute_dtype), "bh1": bh1,
        "wh2": wh2.astype(compute_dtype), "bh2": bh2,
    }
    # Static layout metadata kept OUT of the jitted-arg pytree (plain ints).
    dims = {"d_in": int(d_in), "d_out": int(d_out), "dom_out": int(dom_o)}
    return packed, dims


# ---------------------------------------------------------------------------
# Wrapper
# ---------------------------------------------------------------------------
@functools.partial(jax.jit, static_argnames=("d_out", "dom_o", "tile_b"))
def simple_autoencoder_forward(x, packed, *, d_out: int, dom_o: int,
                               tile_b: int = 1024):
    B, d_in = x.shape
    H1P = packed["we1"].shape[1]
    ENCP = packed["we2"].shape[1]
    HEADP = packed["wh1"].shape[1]
    OUTP = packed["wh2"].shape[1]

    # ---- batch tiling ----
    pB8 = _round_up(B, 8)
    tb = min(tile_b, pB8)
    # v7x has 2 TensorCores: once the batch is big enough to amortize the
    # per-step overhead, make sure the "parallel" axis has >= 2 grid steps.
    if pB8 // tb < 2 and pB8 >= 512:
        tb = _round_up(pl.cdiv(pB8, 2), 8)
    pB = _round_up(pB8, tb)

    # Cast to bf16 once on the host (halves input DMA); pad only if needed.
    x_bf = x.astype(jnp.bfloat16)
    xp = x_bf if pB == B else jnp.zeros((pB, d_in), jnp.bfloat16).at[:B].set(x_bf)

    const = lambda i: (0, 0)          # weights/biases resident across grid steps
    batched = lambda i: (i, 0)

    weight_keys = ("we1", "be1", "we2", "be2", "wh1", "bh1", "wh2", "bh2")
    weight_bytes = sum(int(packed[k].size) * packed[k].dtype.itemsize
                       for k in weight_keys)
    cost = pl.CostEstimate(
        flops=int(2 * pB * (d_in * H1P + H1P * ENCP + ENCP * HEADP + HEADP * OUTP)),
        transcendentals=0,
        bytes_accessed=int(xp.size * xp.dtype.itemsize + weight_bytes
                           + pB * OUTP * 2),
    )

    out = pl.pallas_call(
        autoencoder_kernel,
        out_shape=jax.ShapeDtypeStruct((pB, OUTP), jnp.bfloat16),
        grid=(pB // tb,),
        in_specs=[
            pl.BlockSpec((tb, d_in), batched),      # x (bf16)
            pl.BlockSpec((d_in, H1P), const),       # we1
            pl.BlockSpec((1, H1P), const),          # be1
            pl.BlockSpec((H1P, ENCP), const),       # we2
            pl.BlockSpec((1, ENCP), const),         # be2
            pl.BlockSpec((ENCP, HEADP), const),     # fused head1 weight
            pl.BlockSpec((1, HEADP), const),        # fused head1 bias
            pl.BlockSpec((HEADP, OUTP), const),     # fused head2 weight
            pl.BlockSpec((1, OUTP), const),         # fused head2 bias
        ],
        out_specs=pl.BlockSpec((tb, OUTP), batched),
        compiler_params=pltpu.CompilerParams(
            dimension_semantics=("parallel",),      # shard batch over TCs (v7x)
            vmem_limit_bytes=32 * 1024 * 1024),     # covers v5e's 16 MiB default
        cost_estimate=cost,
    )(xp,
      packed["we1"], packed["be1"], packed["we2"], packed["be2"],
      packed["wh1"], packed["bh1"], packed["wh2"], packed["bh2"])

    # Static slices (d_out / dom_o are static ints): y in cols [0:32],
    # domain_out in col [32] of the bf16 slab.
    y = out[:B, :d_out]
    dom = out[:B, d_out:d_out + dom_o]
    return y, dom


# ---------------------------------------------------------------------------
# Init + demo
# ---------------------------------------------------------------------------
def init_linear(key, fan_in, fan_out):
    """PyTorch-default uniform(-1/sqrt(fan_in), 1/sqrt(fan_in)); W stored [in, out]."""
    kw, kb = jax.random.split(key)
    bound = 1.0 / (fan_in ** 0.5)
    w = jax.random.uniform(kw, (fan_in, fan_out), jnp.float32, -bound, bound)
    b = jax.random.uniform(kb, (1, fan_out), jnp.float32, -bound, bound)
    return w, b


if __name__ == "__main__":
    shape = (32, 64, 250)   # encoder widths; encoded dim must be 250 for domain head
    B = 16                  # small demo batch (tile-aligned -> no host pad pass)

    key = jax.random.PRNGKey(0)
    keys = jax.random.split(key, 8)

    params = {}
    # encoder: Linear(32,64), Linear(64,250)
    params["we1"], params["be1"] = init_linear(keys[0], shape[0], shape[1])
    params["we2"], params["be2"] = init_linear(keys[1], shape[1], shape[2])
    # decoder: Linear(250,64), Linear(64,32)
    params["wd1"], params["bd1"] = init_linear(keys[2], shape[2], shape[1])
    params["wd2"], params["bd2"] = init_linear(keys[3], shape[1], shape[0])
    # domain classifier: Linear(250,50), Linear(50,1)
    params["wm1"], params["bm1"] = init_linear(keys[4], 250, 50)
    params["wm2"], params["bm2"] = init_linear(keys[5], 50, 1)

    x = jax.random.normal(keys[6], (B, shape[0]), jnp.float32)

    # Pack (pad + fuse + bf16-cast) once on the host.
    packed, dims = pack_params(params, shape, compute_dtype=jnp.bfloat16)

    y, dom_out = simple_autoencoder_forward(
        x, packed, d_out=dims["d_out"], dom_o=dims["dom_out"])
    jax.block_until_ready((y, dom_out))

    # Reference in plain JAX, mirroring the kernel's numeric path
    # (bf16 MXU operands, f32 accumulation, f32 bias/ReLU), unpadded weights.
    cd = jnp.bfloat16
    def mm(a, w):
        return jnp.dot(a.astype(cd), w.astype(cd),
                       preferred_element_type=jnp.float32)
    def relu(a):
        return jnp.maximum(a, 0.0)

    enc = mm(relu(mm(x, params["we1"]) + params["be1"]), params["we2"]) + params["be2"]
    r = relu(enc)
    dom_ref = mm(relu(mm(r, params["wm1"]) + params["bm1"]), params["wm2"]) + params["bm2"]
    y_ref = mm(relu(mm(r, params["wd1"]) + params["bd1"]), params["wd2"]) + params["bd2"]

    assert y.shape == (B, shape[0]) and dom_out.shape == (B, 1)
    # bf16 output slab -> compare with loose tolerances (forward is bf16-MXU anyway).
    assert jnp.allclose(y.astype(jnp.float32), y_ref, atol=2e-2, rtol=2e-2)
    assert jnp.allclose(dom_out.astype(jnp.float32), dom_ref, atol=2e-2, rtol=2e-2)

    print("KERNEL_OK")
</pallas_src>

<mosaic_0001>
module attributes {stable_mosaic.version = 11 : i64} {
  func.func @autoencoder_kernel(%arg0: i32, %arg1: memref<16x32xbf16, #tpu.memory_space<vmem>>, %arg2: memref<32x128xbf16, #tpu.memory_space<vmem>>, %arg3: memref<1x128xf32, #tpu.memory_space<vmem>>, %arg4: memref<128x256xbf16, #tpu.memory_space<vmem>>, %arg5: memref<1x256xf32, #tpu.memory_space<vmem>>, %arg6: memref<256x128xbf16, #tpu.memory_space<vmem>>, %arg7: memref<1x128xf32, #tpu.memory_space<vmem>>, %arg8: memref<128x128xbf16, #tpu.memory_space<vmem>>, %arg9: memref<1x128xf32, #tpu.memory_space<vmem>>, %arg10: memref<16x128xbf16, #tpu.memory_space<vmem>>) attributes {dimension_semantics = [#tpu.dimension_semantics<parallel>], iteration_bounds = array<i64: 1>, scalar_prefetch = 0 : i64, scratch_operands = 0 : i64, tpu.core_type = #tpu.core_type<tc>, window_params = [{transform_indices = @transform_0, window_bounds = array<i64: 16, 32>}, {pipeline_mode = #tpu.pipeline_mode<synchronous>, transform_indices = @transform_1, window_bounds = array<i64: 32, 128>}, {pipeline_mode = #tpu.pipeline_mode<synchronous>, transform_indices = @transform_2, window_bounds = array<i64: 1, 128>}, {pipeline_mode = #tpu.pipeline_mode<synchronous>, transform_indices = @transform_3, window_bounds = array<i64: 128, 256>}, {pipeline_mode = #tpu.pipeline_mode<synchronous>, transform_indices = @transform_4, window_bounds = array<i64: 1, 256>}, {pipeline_mode = #tpu.pipeline_mode<synchronous>, transform_indices = @transform_5, window_bounds = array<i64: 256, 128>}, {pipeline_mode = #tpu.pipeline_mode<synchronous>, transform_indices = @transform_6, window_bounds = array<i64: 1, 128>}, {pipeline_mode = #tpu.pipeline_mode<synchronous>, transform_indices = @transform_7, window_bounds = array<i64: 128, 128>}, {pipeline_mode = #tpu.pipeline_mode<synchronous>, transform_indices = @transform_8, window_bounds = array<i64: 1, 128>}, {transform_indices = @transform_9, window_bounds = array<i64: 16, 128>}]} {
    %c0 = arith.constant 0 : index
    %c0_0 = arith.constant 0 : index
    %0 = vector.load %arg1[%c0, %c0_0] : memref<16x32xbf16, #tpu.memory_space<vmem>>, vector<16x32xbf16>
    %c0_1 = arith.constant 0 : index
    %c0_2 = arith.constant 0 : index
    %1 = vector.load %arg2[%c0_1, %c0_2] : memref<32x128xbf16, #tpu.memory_space<vmem>>, vector<32x128xbf16>
    %cst = arith.constant dense<0.000000e+00> : vector<16x128xf32>
    %2 = tpu.matmul %0, %1, %cst {dimension_numbers = #tpu.dot_dimension_numbers<[1], [0], [0], [1], [0, 0, 1, 1], [], []>} : vector<16x32xbf16>, vector<32x128xbf16>, vector<16x128xf32> -> vector<16x128xf32>
    %c0_3 = arith.constant 0 : index
    %c0_4 = arith.constant 0 : index
    %3 = vector.load %arg3[%c0_3, %c0_4] : memref<1x128xf32, #tpu.memory_space<vmem>>, vector<1x128xf32>
    %4 = vector.broadcast %3 : vector<1x128xf32> to vector<16x128xf32>
    %5 = arith.addf %2, %4 : vector<16x128xf32>
    %cst_5 = arith.constant 0.000000e+00 : f32
    %6 = vector.broadcast %cst_5 : f32 to vector<16x128xf32>
    %7 = arith.maximumf %5, %6 : vector<16x128xf32>
    %8 = arith.truncf %7 : vector<16x128xf32> to vector<16x128xbf16>
    %c0_6 = arith.constant 0 : index
    %c0_7 = arith.constant 0 : index
    %9 = vector.load %arg4[%c0_6, %c0_7] : memref<128x256xbf16, #tpu.memory_space<vmem>>, vector<128x256xbf16>
    %cst_8 = arith.constant dense<0.000000e+00> : vector<16x256xf32>
    %10 = tpu.matmul %8, %9, %cst_8 {dimension_numbers = #tpu.dot_dimension_numbers<[1], [0], [0], [1], [0, 0, 1, 1], [], []>} : vector<16x128xbf16>, vector<128x256xbf16>, vector<16x256xf32> -> vector<16x256xf32>
    %c0_9 = arith.constant 0 : index
    %c0_10 = arith.constant 0 : index
    %11 = vector.load %arg5[%c0_9, %c0_10] : memref<1x256xf32, #tpu.memory_space<vmem>>, vector<1x256xf32>
    %12 = vector.broadcast %11 : vector<1x256xf32> to vector<16x256xf32>
    %13 = arith.addf %10, %12 : vector<16x256xf32>
    %cst_11 = arith.constant 0.000000e+00 : f32
    %14 = vector.broadcast %cst_11 : f32 to vector<16x256xf32>
    %15 = arith.maximumf %13, %14 : vector<16x256xf32>
    %16 = arith.truncf %15 : vector<16x256xf32> to vector<16x256xbf16>
    %c0_12 = arith.constant 0 : index
    %c0_13 = arith.constant 0 : index
    %17 = vector.load %arg6[%c0_12, %c0_13] : memref<256x128xbf16, #tpu.memory_space<vmem>>, vector<256x128xbf16>
    %cst_14 = arith.constant dense<0.000000e+00> : vector<16x128xf32>
    %18 = tpu.matmul %16, %17, %cst_14 {dimension_numbers = #tpu.dot_dimension_numbers<[1], [0], [0], [1], [0, 0, 1, 1], [], []>} : vector<16x256xbf16>, vector<256x128xbf16>, vector<16x128xf32> -> vector<16x128xf32>
    %c0_15 = arith.constant 0 : index
    %c0_16 = arith.constant 0 : index
    %19 = vector.load %arg7[%c0_15, %c0_16] : memref<1x128xf32, #tpu.memory_space<vmem>>, vector<1x128xf32>
    %20 = vector.broadcast %19 : vector<1x128xf32> to vector<16x128xf32>
    %21 = arith.addf %18, %20 : vector<16x128xf32>
    %cst_17 = arith.constant 0.000000e+00 : f32
    %22 = vector.broadcast %cst_17 : f32 to vector<16x128xf32>
    %23 = arith.maximumf %21, %22 : vector<16x128xf32>
    %24 = arith.truncf %23 : vector<16x128xf32> to vector<16x128xbf16>
    %c0_18 = arith.constant 0 : index
    %c0_19 = arith.constant 0 : index
    %25 = vector.load %arg8[%c0_18, %c0_19] : memref<128x128xbf16, #tpu.memory_space<vmem>>, vector<128x128xbf16>
    %cst_20 = arith.constant dense<0.000000e+00> : vector<16x128xf32>
    %26 = tpu.matmul %24, %25, %cst_20 {dimension_numbers = #tpu.dot_dimension_numbers<[1], [0], [0], [1], [0, 0, 1, 1], [], []>} : vector<16x128xbf16>, vector<128x128xbf16>, vector<16x128xf32> -> vector<16x128xf32>
    %c0_21 = arith.constant 0 : index
    %c0_22 = arith.constant 0 : index
    %27 = vector.load %arg9[%c0_21, %c0_22] : memref<1x128xf32, #tpu.memory_space<vmem>>, vector<1x128xf32>
    %28 = vector.broadcast %27 : vector<1x128xf32> to vector<16x128xf32>
    %29 = arith.addf %26, %28 : vector<16x128xf32>
    %30 = arith.truncf %29 : vector<16x128xf32> to vector<16x128xbf16>
    %c0_23 = arith.constant 0 : index
    %c0_24 = arith.constant 0 : index
    %31 = vector.load %arg10[%c0_23, %c0_24] : memref<16x128xbf16, #tpu.memory_space<vmem>>, vector<16x128xbf16>
    tpu.vector_store %arg10[%c0_23, %c0_24], %30 {strides = array<i32>} : memref<16x128xbf16, #tpu.memory_space<vmem>>, vector<16x128xbf16>,
    return
  }
  func.func @transform_0(%arg0: i32) -> (i32, i32) {
    %c0_i32 = arith.constant 0 : i32
    %c0_i32_0 = arith.constant 0 : i32
    return %arg0, %c0_i32 : i32, i32
  }
  func.func @transform_1(%arg0: i32) -> (i32, i32) {
    %c0_i32 = arith.constant 0 : i32
    %c0_i32_0 = arith.constant 0 : i32
    %c0_i32_1 = arith.constant 0 : i32
    return %c0_i32, %c0_i32_0 : i32, i32
  }
  func.func @transform_2(%arg0: i32) -> (i32, i32) {
    %c0_i32 = arith.constant 0 : i32
    %c0_i32_0 = arith.constant 0 : i32
    %c0_i32_1 = arith.constant 0 : i32
    return %c0_i32, %c0_i32_0 : i32, i32
  }
  func.func @transform_3(%arg0: i32) -> (i32, i32) {
    %c0_i32 = arith.constant 0 : i32
    %c0_i32_0 = arith.constant 0 : i32
    %c0_i32_1 = arith.constant 0 : i32
    return %c0_i32, %c0_i32_0 : i32, i32
  }
  func.func @transform_4(%arg0: i32) -> (i32, i32) {
    %c0_i32 = arith.constant 0 : i32
    %c0_i32_0 = arith.constant 0 : i32
    %c0_i32_1 = arith.constant 0 : i32
    return %c0_i32, %c0_i32_0 : i32, i32
  }
  func.func @transform_5(%arg0: i32) -> (i32, i32) {
    %c0_i32 = arith.constant 0 : i32
    %c0_i32_0 = arith.constant 0 : i32
    %c0_i32_1 = arith.constant 0 : i32
    return %c0_i32, %c0_i32_0 : i32, i32
  }
  func.func @transform_6(%arg0: i32) -> (i32, i32) {
    %c0_i32 = arith.constant 0 : i32
    %c0_i32_0 = arith.constant 0 : i32
    %c0_i32_1 = arith.constant 0 : i32
    return %c0_i32, %c0_i32_0 : i32, i32
  }
  func.func @transform_7(%arg0: i32) -> (i32, i32) {
    %c0_i32 = arith.constant 0 : i32
    %c0_i32_0 = arith.constant 0 : i32
    %c0_i32_1 = arith.constant 0 : i32
    return %c0_i32, %c0_i32_0 : i32, i32
  }
  func.func @transform_8(%arg0: i32) -> (i32, i32) {
    %c0_i32 = arith.constant 0 : i32
    %c0_i32_0 = arith.constant 0 : i32
    %c0_i32_1 = arith.constant 0 : i32
    return %c0_i32, %c0_i32_0 : i32, i32
  }
  func.func @transform_9(%arg0: i32) -> (i32, i32) {
    %c0_i32 = arith.constant 0 : i32
    %c0_i32_0 = arith.constant 0 : i32
    return %arg0, %c0_i32 : i32, i32
  }
}

</mosaic_0001>

<bundles_post_ra>
// kernel: simple_autoencoder_forward.1
= control target key start
LH: loop header
LB: loop body
LE: loop exit
PB: predicated region body
PF: predicated region fallthrough
CT: control target
= control target key end

     0   :  { %14 = vsyncpa [#allocation3], 0  ;;  %s1005_s0 = inlined_call_operand.vmem [shape: bf16[16,32], index: 0, kind: input, shape index: {}]   ;;  %s1006_s1 = inlined_call_operand.vmem [shape: bf16[32,128], index: 1, kind: input, shape index: {}]   ;;  %s1007_s2 = inlined_call_operand.vmem [shape: f32[1,128], index: 2, kind: input, shape index: {}]   ;;  %s1008_s3 = inlined_call_operand.hbm [shape: bf16[128,256], index: 3, kind: input, shape index: {}]   ;;  %s1009_s4 = inlined_call_operand.vmem [shape: f32[1,256], index: 4, kind: input, shape index: {}]   ;;  %s1010_s5 = inlined_call_operand.hbm [shape: bf16[256,128], index: 5, kind: input, shape index: {}]   ;;  %s1011_s6 = inlined_call_operand.vmem [shape: f32[1,128], index: 6, kind: input, shape index: {}]   ;;  %s1012_s7 = inlined_call_operand.hbm [shape: bf16[128,128], index: 7, kind: input, shape index: {}]   ;;  %s1013_s8 = inlined_call_operand.vmem [shape: f32[1,128], index: 8, kind: input, shape index: {}]   ;;  %s1014_s9 = inlined_call_operand.vmem [shape: bf16[16,128], index: 9, kind: output, shape index: {}]  }
   0x1   :  { %15 = vsyncpa [#allocation5], 0  ;;  %s865_s30 = smov [#allocation4]   ;;  %s795_s13 = scalar_lea.hbm %s1010_s5, 2048 }
   0x2   :  { %s41_s10 = sshll.u32 %s865_s30, 4  ;;  %p796_p0 = scmp.ne.s32.totalorder %s1010_s5, %s795_s13  ;;  %s42_s10 = int_to_ptr.vmem [resolvable:$true] %s41_s10 }
   0x3   :  { %p799_p1 = scmp.lt.u32.totalorder %s795_s13, %s1010_s5 }
   0x5   :  { %p801_p2 = pnand %p799_p1, %p796_p0 }
   0x7   :  { %804 = shalt.err (!%p801_p2)
}
   0x8   :  { %s805_s18 = scalar_lea.vmem %s42_s10, 2048  ;;  %p810_p4 = scmp.lt.s32.totalorder %s42_s10, %s42_s10 }
   0x9   :  { %p806_p3 = scmp.ne.s32.totalorder %s42_s10, %s805_s18  ;;  %p811_p5 = scmp.lt.s32.totalorder %s805_s18, %s805_s18 }
   0xb   :  { %p812_p6 = por %p811_p5, %p810_p4 }
   0xd   :  { %p813_p7 = pnand %p812_p6, %p806_p3 }
   0xf   :  { %816 = shalt.err (!%p813_p7)
}
  0x10   :  { %s866_s19 = smov 64   ;;  %s867_s20 = smov 4  }
  0x11   :  { %47 = dma.hbm_to_vmem [thread:$0]  %s1010_s5, 2048, %s42_s10, [#allocation5], %s866_s19, %s866_s19, %s867_s20  }
  0x12   :  { %s868_s23 = smov [#allocation2]   ;;  %s817_s27 = scalar_lea.hbm %s1008_s3, 2048 }
  0x13   :  { %s27_s24 = sshll.u32 %s868_s23, 4  ;;  %p818_p8 = scmp.ne.s32.totalorder %s1008_s3, %s817_s27  ;;  %s28_s24 = int_to_ptr.vmem [resolvable:$true] %s27_s24 }
  0x14   :  { %p821_p9 = scmp.lt.u32.totalorder %s817_s27, %s1008_s3 }
  0x16   :  { %p823_p10 = pnand %p821_p9, %p818_p8 }
  0x18   :  { %826 = shalt.err (!%p823_p10)
}
  0x19   :  { %s827_s12 = scalar_lea.vmem %s28_s24, 2048  ;;  %p832_p12 = scmp.lt.s32.totalorder %s28_s24, %s28_s24 }
  0x1a   :  { %p828_p11 = scmp.ne.s32.totalorder %s28_s24, %s827_s12  ;;  %p833_p13 = scmp.lt.s32.totalorder %s827_s12, %s827_s12 }
  0x1c   :  { %p834_p0 = por %p833_p13, %p832_p12 }
  0x1e   :  { %p835_p1 = pnand %p834_p0, %p828_p11 }
  0x20   :  { %838 = shalt.err (!%p835_p1)
}
  0x21   :  { %s869_s5 = smov 128   ;;  %s870_s10 = smov 8  }
  0x22   :  { %33 = dma.hbm_to_vmem [thread:$0]  %s1008_s3, 2048, %s28_s24, [#allocation3], %s869_s5, %s869_s5, %s870_s10  }
  0x23   :  { %s871_s15 = smov [#allocation6]   ;;  %s839_s21 = scalar_lea.hbm %s1012_s7, 1024 }
  0x24   :  { %s55_s16 = sshll.u32 %s871_s15, 4  ;;  %p840_p2 = scmp.ne.s32.totalorder %s1012_s7, %s839_s21  ;;  %s56_s16 = int_to_ptr.vmem [resolvable:$true] %s55_s16 }
  0x25   :  { %p843_p3 = scmp.lt.u32.totalorder %s839_s21, %s1012_s7 }
  0x27   :  { %p845_p4 = pnand %p843_p3, %p840_p2 }
  0x29   :  { %848 = shalt.err (!%p845_p4)
}
  0x2a   :  { %s849_s27 = scalar_lea.vmem %s56_s16, 1024  ;;  %p854_p6 = scmp.lt.s32.totalorder %s56_s16, %s56_s16 }
  0x2b   :  { %p850_p5 = scmp.ne.s32.totalorder %s56_s16, %s849_s27  ;;  %p855_p7 = scmp.lt.s32.totalorder %s849_s27, %s849_s27 }
  0x2d   :  { %p856_p8 = por %p855_p7, %p854_p6 }
  0x2f   :  { %p857_p9 = pnand %p856_p8, %p850_p5 }
  0x31   :  { %860 = shalt.err (!%p857_p9)
}
  0x32   :  { %61 = dma.hbm_to_vmem [thread:$0]  %s1012_s7, 1024, %s56_s16, [#allocation5], %s866_s19, %s866_s19, %s867_s20  }
  0x33   :  { %861 = dma.done.wait [#allocation3], 2048  }
  0x34   :  { %862 = vsyncadd [#allocation3], 4294965248 }
  0x35   :  { %863 = dma.done.wait [#allocation5], 3072  }
  0x36   :  { %864 = vsyncadd [#allocation5], 4294964224  ;;  %v872_v0 = vmov 0.0   ;;  %vm873_vm0 = vmmov 0   ;;  %v744_v1 = vld [vmem:[%s1006_s1] sm:$0xff]   ;;  %v745_v2 = vld [vmem:[%s1006_s1 + $0x8] sm:$0xff]   ;;  %v170_v52 = vlaneseq }
  0x37   :  { %706 = vmatprep.subr.bf16.mxu0 %v872_v0  ;;  %710 = vmatprep.mubr.msk.bf16.mxu0 %vm873_vm0, %v872_v0  ;;  %v747_v3 = vld [vmem:[#allocation2 + $0x4] ss:$8 sps:$4 sm:$0xff]   ;;  %v749_v4 = vld [vmem:[#allocation2] ss:$8 sps:$4 sm:$0xff]   ;;  %v750_v6 = vld [vmem:[#allocation2 + $0x14] ss:$8 sps:$4 sm:$0xff]  }
  0x38   :  { %707 = vmatpush3.bf16.msra.mxu0 %v744_v1  ;;  %v746_v5 = vld [vmem:[%s1005_s0] sm:$0xff]   ;;  %260 = vmatprep.subr.bf16.mxu1 %v747_v3  ;;  %vm104_vm1 = vcmask 261120   ;;  %v752_v7 = vld [vmem:[#allocation2 + $0x10] ss:$8 sps:$4 sm:$0xff]   ;;  %v756_v10 = vld [vmem:[#allocation2 + $0x34] ss:$8 sps:$4 sm:$0xff]  }
  0x39   :  { %708 = vmatprep.subr.bf16.mxu0 %v872_v0  ;;  %261 = vmatpush1.bf16.msra.mxu1 %v749_v4  ;;  %v753_v8 = vld [vmem:[#allocation2 + $0x24] ss:$8 sps:$4 sm:$0xff]   ;;  %v755_v9 = vld [vmem:[#allocation2 + $0x20] ss:$8 sps:$4 sm:$0xff]   ;;  %v758_v11 = vld [vmem:[#allocation2 + $0x30] ss:$8 sps:$4 sm:$0xff]  }
  0x3a   :  { %262 = vmatprep.subr.bf16.mxu1 %v750_v6  ;;  %v759_v12 = vld [vmem:[#allocation2 + $0x44] ss:$8 sps:$4 sm:$0xff]   ;;  %v761_v13 = vld [vmem:[#allocation2 + $0x40] ss:$8 sps:$4 sm:$0xff]   ;;  %v762_v14 = vld [vmem:[#allocation2 + $0x54] ss:$8 sps:$4 sm:$0xff]  }
  0x3b   :  { %v764_v15 = vld [vmem:[#allocation2 + $0x50] ss:$8 sps:$4 sm:$0xff]   ;;  %v765_v16 = vld [vmem:[#allocation2 + $0x64] ss:$8 sps:$4 sm:$0xff]   ;;  %v767_v17 = vld [vmem:[#allocation2 + $0x60] ss:$8 sps:$4 sm:$0xff]  }
  0x3c   :  { %709 = vmatpush3.bf16.msra.mxu0 %v745_v2  ;;  %v768_v18 = vld [vmem:[#allocation2 + $0x74] ss:$8 sps:$4 sm:$0xff]   ;;  %v770_v19 = vld [vmem:[#allocation2 + $0x70] ss:$8 sps:$4 sm:$0xff]   ;;  %v874_v20 = vmov 0   ;;  %v771_v21 = vld [vmem:[#allocation4 + $0x40] sm:$0xff]  }
  0x3d   :  { %263 = vmatpush1.bf16.msra.mxu1 %v752_v7  ;;  %292 = vmatprep.mubr.bf16.mxu1 %v874_v20  ;;  %v772_v22 = vld [vmem:[#allocation4] sm:$0xff]   ;;  %v773_v23 = vld [vmem:[#allocation4 + $0x48] sm:$0xff]   ;;  %v775_v25 = vld [vmem:[#allocation4 + $0x50] sm:$0xff]   ;;  %v171_v53 = vshrl.u32 %v170_v52, 7 }
  0x3e   :  { %264 = vmatprep.subr.bf16.mxu1 %v753_v8  ;;  %675 = vmatprep.subr.bf16.mxu0 %v771_v21  ;;  %v774_v24 = vld [vmem:[#allocation4 + $0x8] sm:$0xff]   ;;  %v776_v26 = vld [vmem:[#allocation4 + $0x10] sm:$0xff]   ;;  %v777_v27 = vld [vmem:[#allocation4 + $0x58] sm:$0xff]  }
  0x3f   :  { %711 = vmatmul.mubr.msk.bf16.vlgmr.msra.gmra.mrb[0].mxu0 %vm104_vm1, %v746_v5  ;;  %v778_v28 = vld [vmem:[#allocation4 + $0x18] sm:$0xff]   ;;  %v779_v29 = vld [vmem:[#allocation4 + $0x60] sm:$0xff]   ;;  %v781_v31 = vld [vmem:[#allocation4 + $0x68] sm:$0xff]   ;;  %v172_v54 = vsub.s32 0, %v171_v53  ;;  %v176_v56 = vsub.s32 1, %v171_v53 }
  0x40   :  { %676 = vmatpush3.bf16.msra.mxu0 %v772_v22  ;;  %v780_v30 = vld [vmem:[#allocation4 + $0x20] sm:$0xff]   ;;  %v782_v42 = vld [vmem:[#allocation4 + $0x28] sm:$0xff]   ;;  %v783_v43 = vld [vmem:[#allocation4 + $0x70] sm:$0xff]  }
  0x41   :  { %265 = vmatpush1.bf16.msra.mxu1 %v755_v9  ;;  %677 = vmatprep.subr.bf16.mxu0 %v773_v23  ;;  %v616_v32 = vld [vmem:[%s1007_s2] ss:$0 sm:$0xff]  ;;  %v784_v44 = vld [vmem:[#allocation4 + $0x30] sm:$0xff]   ;;  %v785_v45 = vld [vmem:[#allocation4 + $0x78] sm:$0xff]  }
  0x42   :  { %266 = vmatprep.subr.bf16.mxu1 %v756_v10  ;;  %v786_v46 = vld [vmem:[#allocation4 + $0x38] sm:$0xff]   ;;  %v787_v47 = vld [vmem:[#allocation6] sm:$0xff]   ;;  %v788_v48 = vld [vmem:[#allocation6 + $0x8] sm:$0xff]  }
  0x43   :  { %v789_v49 = vld [vmem:[#allocation6 + $0x10] sm:$0xff]   ;;  %v790_v50 = vld [vmem:[#allocation6 + $0x18] sm:$0xff]   ;;  %v791_v51 = vld [vmem:[#allocation6 + $0x20] sm:$0xff]  }
  0x44   :  { %678 = vmatpush3.bf16.msra.mxu0 %v774_v24  ;;  %v168_v55 = vld [vmem:[%s1009_s4] sm:$0x3]  ;;  %v792_v10 = vld [vmem:[#allocation6 + $0x28] sm:$0xff]  }
  0x45   :  { %267 = vmatpush1.bf16.msra.mxu1 %v758_v11  ;;  %679 = vmatprep.subr.bf16.mxu0 %v775_v25  ;;  %v173_v57 = vrot.slane %v168_v55, %v172_v54  ;;  %v177_v58 = vrot.slane %v168_v55, %v176_v56  ;;  %v793_v11 = vld [vmem:[#allocation6 + $0x30] sm:$0xff]  }
  0x46   :  { %268 = vmatprep.subr.bf16.mxu1 %v759_v12  ;;  %v794_v12 = vld [vmem:[#allocation6 + $0x38] sm:$0xff]  }
  0x48   :  { %680 = vmatpush3.bf16.msra.mxu0 %v776_v26 }
  0x49   :  { %269 = vmatpush1.bf16.msra.mxu1 %v761_v13  ;;  %681 = vmatprep.subr.bf16.mxu0 %v777_v27 }
  0x4a   :  { %270 = vmatprep.subr.bf16.mxu1 %v762_v14  ;;  %v637_v14 = vld [vmem:[%s1011_s6] ss:$0 sm:$0xff] }
  0x4c   :  { %682 = vmatpush3.bf16.msra.mxu0 %v778_v28 }
  0x4d   :  { %271 = vmatpush1.bf16.msra.mxu1 %v764_v15  ;;  %683 = vmatprep.subr.bf16.mxu0 %v779_v29 }
  0x4e   :  { %272 = vmatprep.subr.bf16.mxu1 %v765_v16 }
  0x50   :  { %684 = vmatpush3.bf16.msra.mxu0 %v780_v30 }
  0x51   :  { %273 = vmatpush1.bf16.msra.mxu1 %v767_v17  ;;  %685 = vmatprep.subr.bf16.mxu0 %v781_v31 }
  0x52   :  { %274 = vmatprep.subr.bf16.mxu1 %v768_v18 }
  0x54   :  { %686 = vmatpush3.bf16.msra.mxu0 %v782_v42 }
  0x55   :  { %275 = vmatpush1.bf16.msra.mxu1 %v770_v19  ;;  %687 = vmatprep.subr.bf16.mxu0 %v783_v43 }
  0x56   :  { %714 = vmatprep.subr.bf16.mxu1 %v872_v0 }
  0x58   :  { %688 = vmatpush3.bf16.msra.mxu0 %v784_v44 }
  0x59   :  { %689 = vmatprep.subr.bf16.mxu0 %v785_v45 }
  0x5c   :  { %690 = vmatpush3.bf16.msra.mxu0 %v786_v46 }
 0x112   :  { %v142_v33 = vpop.f32.mrb[0].mxu0 }
 0x113   :  { %v143_v34 = vadd.f32 %v616_v32, %v142_v33  ;;  %v712_v35 = vpop.f32.mrb[1].mxu0 }
 0x114   :  { %v145_v36 = vpop.f32.mrb[2].mxu0 }
 0x115   :  { %v146_v37 = vadd.f32 %v616_v32, %v145_v36  ;;  %v713_v38 = vpop.f32.mrb[3].mxu0  ;;  %v149_v39 = vmax.f32 %v143_v34, 0.0 }
 0x117   :  { %v150_v40 = vmax.f32 %v146_v37, 0.0 }
 0x119   :  { %v151_v41 = vpack.c.bf16 %v150_v40, %v149_v39 }
 0x11b   :  { %293 = vmatmul.mubr.bf16.vlgmr.msra.gmra.mrb[0].mxu1 %v151_v41 }
 0x11c   :  { %730 = vmatprep.mubr.msk.bf16.mxu1 %vm873_vm0, %v872_v0  ;;  %715 = vmatpush3.bf16.msra.mxu1 %v787_v47 }
 0x11d   :  { %716 = vmatprep.subr.bf16.mxu1 %v872_v0 }
 0x120   :  { %717 = vmatpush3.bf16.msra.mxu1 %v788_v48 }
 0x121   :  { %718 = vmatprep.subr.bf16.mxu1 %v872_v0 }
 0x124   :  { %719 = vmatpush3.bf16.msra.mxu1 %v789_v49 }
 0x125   :  { %720 = vmatprep.subr.bf16.mxu1 %v872_v0 }
 0x128   :  { %721 = vmatpush3.bf16.msra.mxu1 %v790_v50 }
 0x129   :  { %722 = vmatprep.subr.bf16.mxu1 %v872_v0 }
 0x12c   :  { %723 = vmatpush3.bf16.msra.mxu1 %v791_v51 }
 0x12d   :  { %724 = vmatprep.subr.bf16.mxu1 %v872_v0 }
 0x130   :  { %725 = vmatpush3.bf16.msra.mxu1 %v792_v10 }
 0x131   :  { %726 = vmatprep.subr.bf16.mxu1 %v872_v0 }
 0x134   :  { %727 = vmatpush3.bf16.msra.mxu1 %v793_v11 }
 0x135   :  { %728 = vmatprep.subr.bf16.mxu1 %v872_v0  ;;  %v654_v0 = vld [vmem:[%s1013_s8] ss:$0 sm:$0xff] }
 0x138   :  { %729 = vmatpush3.bf16.msra.mxu1 %v794_v12 }
 0x1ee   :  { %v294_v59 = vpop.f32.mrb[0].mxu1 }
 0x1ef   :  { %v295_v60 = vadd.f32 %v294_v59, %v173_v57  ;;  %v296_v61 = vpop.f32.mrb[1].mxu1 }
 0x1f0   :  { %v297_v62 = vadd.f32 %v296_v61, %v177_v58  ;;  %v298_v63 = vpop.f32.mrb[2].mxu1 }
 0x1f1   :  { %v299_v1 = vadd.f32 %v298_v63, %v173_v57  ;;  %v300_v2 = vpop.f32.mrb[3].mxu1  ;;  %v303_v4 = vmax.f32 %v295_v60, 0.0 }
 0x1f2   :  { %v301_v3 = vadd.f32 %v300_v2, %v177_v58  ;;  %v304_v6 = vmax.f32 %v297_v62, 0.0 }
 0x1f3   :  { %v305_v5 = vmax.f32 %v299_v1, 0.0 }
 0x1f4   :  { %v306_v7 = vmax.f32 %v301_v3, 0.0 }
 0x1f5   :  { %v307_v8 = vpack.c.bf16 %v305_v5, %v303_v4 }
 0x1f6   :  { %v308_v9 = vpack.c.bf16 %v306_v7, %v304_v6 }
 0x1f8   :  { %476 = vmatprep.mubr.bf16.mxu0 %v308_v9 }
 0x1f9   :  { %477 = vmatmul.mubr.bf16.vlgmr.msra.gmra.mrb[4].mxu0 %v307_v8 }
 0x2cc   :  { %v691_v13 = vpop.f32.mrb[4].mxu0 }
 0x2cd   :  { %v692_v15 = vpop.f32.mrb[5].mxu0 }
 0x2ce   :  { %v693_v16 = vadd.f32 %v692_v15, %v691_v13  ;;  %v694_v17 = vpop.f32.mrb[6].mxu0 }
 0x2cf   :  { %v695_v18 = vpop.f32.mrb[7].mxu0 }
 0x2d0   :  { %v479_v19 = vadd.f32 %v693_v16, %v637_v14  ;;  %v696_v20 = vadd.f32 %v695_v18, %v694_v17 }
 0x2d2   :  { %v482_v21 = vadd.f32 %v696_v20, %v637_v14  ;;  %v485_v22 = vmax.f32 %v479_v19, 0.0 }
 0x2d4   :  { %v486_v23 = vmax.f32 %v482_v21, 0.0 }
 0x2d6   :  { %v487_v24 = vpack.c.bf16 %v486_v23, %v485_v22 }
 0x2d8   :  { %731 = vmatmul.mubr.bf16.vlgmr.msra.gmra.mrb[4].mxu1 %v487_v24 }
 0x3ab   :  { %v593_v25 = vpop.f32.mrb[4].mxu1 }
 0x3ac   :  { %v732_v26 = vpop.f32.mrb[5].mxu1  ;;  %v594_v28 = vadd.f32 %v654_v0, %v593_v25 }
 0x3ad   :  { %v596_v27 = vpop.f32.mrb[6].mxu1 }
 0x3ae   :  { %v597_v29 = vadd.f32 %v654_v0, %v596_v27  ;;  %v733_v30 = vpop.f32.mrb[7].mxu1 }
 0x3b0   :  { %v670_v31 = vpack.c.bf16 %v597_v29, %v594_v28 }
 0x3b2   :  { %671 = vst [vmem:[%s1014_s9] sm:$0xff] %v670_v31  }
 0x3b3   :  { %614 = vsyncpa [#allocation3], 1 }
 0x3b4   :  { %615 = vsyncpa [#allocation5], 1 }

</bundles_post_ra>
